<compile_context>
chip_gen: v7x
topology: tpu7x:2x2x1
jax: 0.10.0
libtpu: 0.0.40
codegen_flags: <defaults>
</compile_context>

<pallas_src>
import jax
import jax.numpy as jnp
from jax import lax
from jax.experimental import pallas as pl
from jax.experimental.pallas import tpu as pltpu


_LANE = 128            # TPU lane width; pad narrow feature/class dims to this
_DEFAULT_TM = 256      # row-stripe height (multiple of 16 for bf16 sublane packing)
_VMEM_LIMIT = 32 * 1024 * 1024   # explicit scoped-VMEM limit (per-step working set ~6-8 MB
                                 # even at Citeseer size, so ample headroom on v5e/v6e/v7x)


def _round_up(v, m):
    return (v + m - 1) // m * m


def _pad2d(arr, rows, cols):
    r, c = arr.shape
    return jnp.pad(arr, ((0, rows - r), (0, cols - c)))


# --------------------------------------------------------------------------------------
# Kernels
# --------------------------------------------------------------------------------------

def _xw_kernel(x_ref, w_ref, o_ref):
    """One row stripe of X @ W1 (bf16 x bf16 -> f32 acc -> bf16 out)."""
    o_ref[...] = jnp.dot(x_ref[...], w_ref[...],
                         preferred_element_type=jnp.float32).astype(o_ref.dtype)


def _make_gcn_layer_kernel(apply_log_softmax, n_valid_cols):
    """relu(A_stripe @ HW + b); optionally masked log_softmax over the valid class lanes."""
    def kernel(a_ref, hw_ref, b_ref, o_ref):
        acc = jnp.dot(a_ref[...], hw_ref[...], preferred_element_type=jnp.float32)
        h = jnp.maximum(acc + b_ref[...], 0.0)      # relu; eval-mode dropout is identity
        if apply_log_softmax:
            col = lax.broadcasted_iota(jnp.int32, h.shape, 1)
            valid = col < n_valid_cols
            logits = jnp.where(valid, h, jnp.float32(-1e30))
            m = jnp.max(logits, axis=1, keepdims=True)
            e = jnp.where(valid, jnp.exp(logits - m), 0.0)
            s = jnp.sum(e, axis=1, keepdims=True)
            h = jnp.where(valid, logits - m - jnp.log(s), 0.0)
        o_ref[...] = h.astype(o_ref.dtype)
    return kernel


# --------------------------------------------------------------------------------------
# pallas_call wrappers
# --------------------------------------------------------------------------------------

def _feature_matmul(x_bf, w_bf, *, tm):
    """Row-tiled Pallas matmul for the hoisted X @ W1 (large contraction dim F)."""
    np_, f = x_bf.shape
    kpad = w_bf.shape[1]
    grid = (np_ // tm,)
    flops = 2 * np_ * f * kpad
    bytes_accessed = x_bf.size * 2 + w_bf.size * 2 + np_ * kpad * 2
    return pl.pallas_call(
        _xw_kernel,
        out_shape=jax.ShapeDtypeStruct((np_, kpad), jnp.bfloat16),
        grid=grid,
        in_specs=[pl.BlockSpec((tm, f), lambda i: (i, 0)),        # X stripe, streamed
                  pl.BlockSpec((f, kpad), lambda i: (0, 0))],     # W1, resident
        out_specs=pl.BlockSpec((tm, kpad), lambda i: (i, 0)),
        compiler_params=pltpu.CompilerParams(
            dimension_semantics=("parallel",),
            vmem_limit_bytes=_VMEM_LIMIT),
        cost_estimate=pl.CostEstimate(flops=int(flops), transcendentals=0,
                                      bytes_accessed=int(bytes_accessed)),
    )(x_bf, w_bf)


def _gcn_layer(a_bf, hw_bf, b_pad, *, tm, n_valid_cols, apply_log_softmax):
    """One GCN layer: relu(A_hat @ HW + b) [+ log_softmax], row-tiled over A_hat."""
    np_ = a_bf.shape[0]
    kpad = hw_bf.shape[1]
    grid = (np_ // tm,)
    kernel = _make_gcn_layer_kernel(apply_log_softmax, n_valid_cols)
    flops = 2 * np_ * np_ * kpad
    trans = np_ * kpad if apply_log_softmax else 0
    bytes_accessed = a_bf.size * 2 + hw_bf.size * 2 + b_pad.size * 4 + np_ * kpad * 4
    return pl.pallas_call(
        kernel,
        out_shape=jax.ShapeDtypeStruct((np_, kpad), jnp.float32),
        grid=grid,
        in_specs=[pl.BlockSpec((tm, np_), lambda i: (i, 0)),      # A_hat stripe, streamed/pipelined
                  pl.BlockSpec((np_, kpad), lambda i: (0, 0)),    # H@W, VMEM-resident
                  pl.BlockSpec((1, kpad), lambda i: (0, 0))],     # bias
        out_specs=pl.BlockSpec((tm, kpad), lambda i: (i, 0)),     # lane-dense (kpad=128) store
        compiler_params=pltpu.CompilerParams(
            dimension_semantics=("parallel",),
            vmem_limit_bytes=_VMEM_LIMIT),
        cost_estimate=pl.CostEstimate(flops=int(flops), transcendentals=int(trans),
                                      bytes_accessed=int(bytes_accessed)),
    )(a_bf, hw_bf, b_pad)


# --------------------------------------------------------------------------------------
# Glue: normalized adjacency + full forward
# --------------------------------------------------------------------------------------

def build_normalized_adjacency(edge_index, num_nodes):
    """Dense A_hat = D^-1/2 (A + I) D^-1/2, matching PyG gcn_norm (scatter-add edges,
    add_remaining_self_loops with fill value 1)."""
    # TODO(synk): A_hat construction uses XLA scatter (no clean Pallas TPU scatter); a sparse
    # SpMM formulation would avoid the O(N^2) dense adjacency entirely.
    src, dst = edge_index[0], edge_index[1]
    a = jnp.zeros((num_nodes, num_nodes), jnp.float32)
    # message flows source -> target: row = target, col = source; scatter-ADD like PyG
    a = a.at[dst, src].add(1.0)
    diag = jnp.arange(num_nodes)
    d = a[diag, diag]
    a = a.at[diag, diag].set(jnp.where(d > 0.0, d, 1.0))   # add remaining self loops
    deg = jnp.sum(a, axis=1)
    dinv = jnp.where(deg > 0.0, lax.rsqrt(deg), 0.0)
    return dinv[:, None] * a * dinv[None, :]


def method_gnn_forward(x, edge_index, layers, *, tm=_DEFAULT_TM):
    """Eval-mode forward of Method_GNN (cora/citeseer: 3 GCNConv layers; pubmed works too
    since `layers` is a generic list of (W, b))."""
    n, f_in = x.shape
    n_classes = layers[-1][0].shape[1]
    np_ = _round_up(max(n, tm), tm)                      # pad node count to a whole number of stripes

    a_hat = build_normalized_adjacency(edge_index, n)
    a_bf = _pad2d(a_hat, np_, np_).astype(jnp.bfloat16)  # bf16 streamed operand, f32 accumulation

    h_full = None
    k_in = f_in
    for li, (w, b) in enumerate(layers):
        k_out = w.shape[1]
        kpad = _round_up(k_out, _LANE)
        if li == 0:
            # Hoisted large-K feature transform X @ W1, as its own row-tiled Pallas pass.
            x_bf = _pad2d(x, np_, k_in).astype(jnp.bfloat16)
            w_bf = _pad2d(w, k_in, kpad).astype(jnp.bfloat16)
            hw_bf = _feature_matmul(x_bf, w_bf, tm=tm)                     # [np_, kpad] bf16
        else:
            # Tiny inter-layer matmul (<= [N,32]@[32,16]) left in XLA glue.
            hw = jnp.dot(h_full[:n, :k_in], w, preferred_element_type=jnp.float32)
            hw_bf = _pad2d(hw, np_, kpad).astype(jnp.bfloat16)
        b_pad = jnp.pad(b.reshape(1, -1), ((0, 0), (0, kpad - k_out))).astype(jnp.float32)
        is_last = li == len(layers) - 1
        h_full = _gcn_layer(a_bf, hw_bf, b_pad, tm=tm,
                            n_valid_cols=k_out, apply_log_softmax=is_last)
        # F.dropout(training=False) between layers -> identity (eval forward)
        k_in = k_out

    return h_full[:n, :n_classes]


def init_params(key, n_features, n_classes, m_name="cora"):
    """GCNConv-style init: glorot weights, zero biases. Returns list of (W, b)."""
    if m_name in ("cora", "citeseer"):
        dims = [n_features, 32, 16, n_classes]
    elif m_name == "pubmed":
        dims = [n_features, 32, 64, 32, n_classes]
    else:
        raise ValueError(m_name)
    layers = []
    for i, (fi, fo) in enumerate(zip(dims[:-1], dims[1:])):
        k = jax.random.fold_in(key, i)
        lim = (6.0 / (fi + fo)) ** 0.5
        w = jax.random.uniform(k, (fi, fo), jnp.float32, -lim, lim)
        b = jnp.zeros((fo,), jnp.float32)
        layers.append((w, b))
    return layers


def reference_forward(x, a_hat, layers):
    """Pure-JAX reference mirroring the kernel's bf16 rounding points (f32 math otherwise)."""
    f32 = jnp.float32
    bf = lambda t: t.astype(jnp.bfloat16).astype(f32)
    a = bf(a_hat)
    h = x
    for li, (w, b) in enumerate(layers):
        if li == 0:
            hw = bf(jnp.dot(bf(h), bf(w), preferred_element_type=f32))
        else:
            hw = bf(jnp.dot(h, w, preferred_element_type=f32))
        h = jax.nn.relu(jnp.dot(a, hw, preferred_element_type=f32) + b[None, :])
    return jax.nn.log_softmax(h, axis=1)


if __name__ == "__main__":
    key = jax.random.PRNGKey(0)
    k_x, k_e, k_p, k_b = jax.random.split(key, 4)

    n_nodes = 300      # small graph (pads to 2 row stripes of 256)
    n_features = 96    # nFeatures
    n_classes = 7      # nClasses (cora-like)
    n_edges = 900

    # Node features
    x = jax.random.normal(k_x, (n_nodes, n_features), jnp.float32)

    # Random undirected edge list (2, 2E) — symmetrized like citation graphs
    src = jax.random.randint(k_e, (n_edges,), 0, n_nodes)
    dst = jax.random.randint(jax.random.fold_in(k_e, 1), (n_edges,), 0, n_nodes)
    edge_index = jnp.stack([jnp.concatenate([src, dst]),
                            jnp.concatenate([dst, src])], axis=0)

    layers = init_params(k_p, n_features, n_classes, m_name="cora")
    # Give the biases small nonzero values to exercise the bias path
    # (GCNConv default init is zeros; forward semantics are unchanged).
    layers = [(w, 0.05 * jax.random.normal(jax.random.fold_in(k_b, i), b.shape, jnp.float32))
              for i, (w, b) in enumerate(layers)]

    out = method_gnn_forward(x, edge_index, layers)
    out = jax.block_until_ready(out)

    assert out.shape == (n_nodes, n_classes)
    # rows of log_softmax must exp-sum to 1
    row_sums = jnp.exp(out).sum(axis=1)
    assert jnp.allclose(row_sums, 1.0, atol=1e-3), float(jnp.max(jnp.abs(row_sums - 1.0)))

    # compare against a pure-JAX reference with matching bf16 rounding points
    a_hat = build_normalized_adjacency(edge_index, n_nodes)
    ref = reference_forward(x, a_hat, layers)
    assert jnp.allclose(out, ref, atol=2e-2, rtol=2e-2), float(jnp.max(jnp.abs(out - ref)))

    print("KERNEL_OK")
</pallas_src>

<mosaic_0001>
module attributes {stable_mosaic.version = 11 : i64} {
  func.func @_xw_kernel(%arg0: i32, %arg1: memref<256x96xbf16, #tpu.memory_space<vmem>>, %arg2: memref<96x128xbf16, #tpu.memory_space<vmem>>, %arg3: memref<256x128xbf16, #tpu.memory_space<vmem>>) attributes {dimension_semantics = [#tpu.dimension_semantics<parallel>], iteration_bounds = array<i64: 2>, scalar_prefetch = 0 : i64, scratch_operands = 0 : i64, tpu.core_type = #tpu.core_type<tc>, window_params = [{transform_indices = @transform_0, window_bounds = array<i64: 256, 96>}, {pipeline_mode = #tpu.pipeline_mode<synchronous>, transform_indices = @transform_1, window_bounds = array<i64: 96, 128>}, {transform_indices = @transform_2, window_bounds = array<i64: 256, 128>}]} {
    %c0 = arith.constant 0 : index
    %c0_0 = arith.constant 0 : index
    %0 = vector.load %arg1[%c0, %c0_0] : memref<256x96xbf16, #tpu.memory_space<vmem>>, vector<256x96xbf16>
    %c0_1 = arith.constant 0 : index
    %c0_2 = arith.constant 0 : index
    %1 = vector.load %arg2[%c0_1, %c0_2] : memref<96x128xbf16, #tpu.memory_space<vmem>>, vector<96x128xbf16>
    %cst = arith.constant dense<0.000000e+00> : vector<256x128xf32>
    %2 = tpu.matmul %0, %1, %cst {dimension_numbers = #tpu.dot_dimension_numbers<[1], [0], [0], [1], [0, 0, 1, 1], [], []>} : vector<256x96xbf16>, vector<96x128xbf16>, vector<256x128xf32> -> vector<256x128xf32>
    %3 = arith.truncf %2 : vector<256x128xf32> to vector<256x128xbf16>
    %c0_3 = arith.constant 0 : index
    %c0_4 = arith.constant 0 : index
    %4 = vector.load %arg3[%c0_3, %c0_4] : memref<256x128xbf16, #tpu.memory_space<vmem>>, vector<256x128xbf16>
    tpu.vector_store %arg3[%c0_3, %c0_4], %3 {strides = array<i32>} : memref<256x128xbf16, #tpu.memory_space<vmem>>, vector<256x128xbf16>,
    return
  }
  func.func @transform_0(%arg0: i32) -> (i32, i32) {
    %c0_i32 = arith.constant 0 : i32
    %c0_i32_0 = arith.constant 0 : i32
    return %arg0, %c0_i32 : i32, i32
  }
  func.func @transform_1(%arg0: i32) -> (i32, i32) {
    %c0_i32 = arith.constant 0 : i32
    %c0_i32_0 = arith.constant 0 : i32
    %c0_i32_1 = arith.constant 0 : i32
    return %c0_i32, %c0_i32_0 : i32, i32
  }
  func.func @transform_2(%arg0: i32) -> (i32, i32) {
    %c0_i32 = arith.constant 0 : i32
    %c0_i32_0 = arith.constant 0 : i32
    return %arg0, %c0_i32 : i32, i32
  }
}

</mosaic_0001>

<bundles_post_ra>
// kernel: tpu_custom_call.1
= control target key start
LH: loop header
LB: loop body
LE: loop exit
PB: predicated region body
PF: predicated region fallthrough
CT: control target
= control target key end

     0   :  { %7 = vsyncpa [#allocation3], 0  ;;  %s1362_s0 = inlined_call_operand.vmem [shape: bf16[512,96], index: 0, kind: input, shape index: {}]   ;;  %s1363_s1 = inlined_call_operand.vmem [shape: bf16[96,128], index: 1, kind: input, shape index: {}]   ;;  %s1364_s2 = inlined_call_operand.hbm [shape: bf16[512,128], index: 2, kind: output, shape index: {}]  }
   0x1   :  { %9 = vsyncpa [#allocation3 + $0x1], 0  ;;  %s1185_s9 = smov 0   ;;  %s1187_s10 = smov 0  }
   0x2   :  { %s1189_s11 = smov 0   ;;  %s1191_s12 = smov 0  }
   0x3 LB: > { %s1206_s13 = sadd.s32 4294967295, %s1165_s12   ;;  %s752_s14 = sadd.s32 4294967294, %s1165_s12   ;;  %s1165_s12 = sphi %s1191_s12, %s1370_s12   ;;  %s1161_s11 = sphi %s1189_s11, %s1369_s11   ;;  %s1157_s10 = sphi %s1187_s10, %s1368_s10   ;;  %s1153_s9 = sphi %s1185_s9, %s1367_s9  }
   0x4   : > { %s1210_s15 = sadd.s32 1, %s1165_s12   ;;  %s69_s16 = sadd.s32 1, %s1161_s11 }
   0x5   : > { %s66_s17 = ssub.s32 %s1165_s12, %s1210_s15  ;;  %p79_p0 = scmp.ne.s32.totalorder %s1161_s11, %s1157_s10 }
   0x6   : > { %p67_p1 = scmp.eq.s32.totalorder %s66_s17, 0  ;;  %p80_p2 = scmp.eq.s32.totalorder %s1206_s13, 1 }
   0x7   : > { %p85_p3 = scmp.ne.s32.totalorder %s1157_s10, %s1153_s9  ;;  %p86_p4 = scmp.eq.s32.totalorder %s752_s14, 1 }
   0x8   : > { %s1221_s18 = scalar_select %p67_p1, %s1161_s11, %s69_s16  }
   0x9   : > { %p1223_p5 = por %p80_p2, %p79_p0  ;;  %p1227_p6 = por %p86_p4, %p85_p3 }
   0xa   : > { %p755_p7 = scmp.ge.s32.totalorder %s1165_s12, 1  ;;  %p116_p8 = scmp.lt.s32.totalorder %s1165_s12, 3 }
   0xc   : > { %p117_p9 = pnand %p755_p7, %p116_p8 }
   0xd   : > { %v1081_v0 = vld [vmem:[%s1363_s1] sm:$0xff] (!%p117_p9)   ;;  %s757_s23 = sshll.u32 (!%p117_p9), %s1206_s13, 5  ;;  %v1082_v1 = vld [vmem:[%s1363_s1 + $0x8] sm:$0xff] (!%p117_p9)   ;;  %v1083_v2 = vld [vmem:[%s1363_s1 + $0x10] sm:$0xff] (!%p117_p9)   ;;  %vm306_vm0 = vcmask (!%p117_p9), 785408   ;;  %s135_s16 = sand.u32 (!%p117_p9), 1, %s1157_s10  }
   0xe   : > { %120 = sbr.rel (%p117_p9) target bundleno = 294 (0x126), region = 28  ;;  %p139_p10 = scmp.lt.s32.totalorder (!%p117_p9), %s757_s23, 63  ;;  %984 = vmatprep.subr.bf16.mxu0 (!%p117_p9), %v1081_v0  ;;  %1028 = vmatprep.subr.bf16.mxu1 (!%p117_p9), %v1081_v0  ;;  %v1084_v3 = vld [vmem:[%s1363_s1 + $0x18] sm:$0xff] (!%p117_p9)   ;;  %v1085_v6 = vld [vmem:[%s1363_s1 + $0x20] sm:$0xff] (!%p117_p9)   ;;  %v1086_v7 = vld [vmem:[%s1363_s1 + $0x28] sm:$0xff] (!%p117_p9)  }
   0xf   : > { %985 = vmatpush3.bf16.msra.mxu0 (!%p117_p9), %v1081_v0  ;;  %1034 = vmatpush3.bf16.msra.mxu1 (!%p117_p9), %v1081_v0  ;;  %s756_s17 = sshll.u32 (!%p117_p9), %s135_s16, 7  ;;  %s866_s22 = sshll.u32 (!%p117_p9), %s1206_s13, 11 }
  0x10   : > { %986 = vmatprep.subr.bf16.mxu0 (!%p117_p9), %v1082_v1  ;;  %1029 = vmatprep.subr.bf16.mxu1 (!%p117_p9), %v1082_v1  ;;  %s1292_s21 = scalar_lea.vmem (!%p117_p9), [#allocation2], %s756_s17  ;;  %s1311_s26 = scalar_lea.hbm (!%p117_p9), %s1364_s2, %s866_s22 }
  0x11   : > { %s1321_s13 = scalar_lea.sflag (!%p117_p9), [#allocation3], %s135_s16 }
  0x13   : > { %987 = vmatpush3.bf16.msra.mxu0 (!%p117_p9), %v1082_v1  ;;  %1035 = vmatpush3.bf16.msra.mxu1 (!%p117_p9), %v1082_v1 }
  0x14   : > { %988 = vmatprep.subr.bf16.mxu0 (!%p117_p9), %v1083_v2  ;;  %1030 = vmatprep.subr.bf16.mxu1 (!%p117_p9), %v1083_v2 }
  0x15   : > { %s1372_s23 = smov (!%p139_p10, %s757_s23), 63 }
  0x16   : > { %s758_s28 = sshll.u32 %s1372_s23, 2  ;;  %s690_s23 = sshll.u32 %s1292_s21, 4  ;;  %s1313_s23 = int_to_ptr.vmem [resolvable:$true] %s690_s23 }
  0x17   : > { %s1249_s5 = scalar_lea.vmem %s1362_s0, %s758_s28  ;;  %989 = vmatpush3.bf16.msra.mxu0 %v1083_v2  ;;  %1036 = vmatpush3.bf16.msra.mxu1 %v1083_v2  ;;  %s1103_s27 = scalar_lea.vmem %s1313_s23, 2048 }
  0x18   : > { %v1087_v4 = vld [vmem:[%s1249_s5] sm:$0xff]   ;;  %990 = vmatprep.subr.bf16.mxu0 %v1084_v3  ;;  %1031 = vmatprep.subr.bf16.mxu1 %v1084_v3  ;;  %v1089_v8 = vld [vmem:[%s1249_s5 + $0x8] sm:$0xff]   ;;  %v1091_v10 = vld [vmem:[%s1249_s5 + $0x10] sm:$0xff]   ;;  %p1104_p11 = scmp.ne.s32.totalorder %s1313_s23, %s1103_s27  ;;  %s1167_s28 = smov [#allocation2]  }
  0x19   : > { %v1088_v5 = vld [vmem:[%s1249_s5 + $0x40] sm:$0xff]   ;;  %996 = vmatprep.mubr.msk.bf16.mxu0 %vm306_vm0, %v1087_v4  ;;  %v1090_v9 = vld [vmem:[%s1249_s5 + $0x48] sm:$0xff]   ;;  %v1092_v11 = vld [vmem:[%s1249_s5 + $0x50] sm:$0xff]   ;;  %s1107_s29 = sshll.u32 %s1167_s28, 4  ;;  %s1108_s29 = int_to_ptr.vmem [resolvable:$false] %s1107_s29 }
  0x1a   : > { %1012 = vmatprep.mubr.msk.bf16.mxu1 %vm306_vm0, %v1088_v5  ;;  %v1093_v12 = vld [vmem:[%s1249_s5 + $0x18] sm:$0xff]   ;;  %v1095_v14 = vld [vmem:[%s1249_s5 + $0x20] sm:$0xff]   ;;  %v1097_v16 = vld [vmem:[%s1249_s5 + $0x28] sm:$0xff]   ;;  %p1105_p12 = pnand %p1104_p11, %p1223_p5  ;;  %s1109_s30 = scalar_lea.vmem %s1108_s29, 4096 }
  0x1b   : > { %991 = vmatpush3.bf16.msra.mxu0 %v1084_v3  ;;  %1037 = vmatpush3.bf16.msra.mxu1 %v1084_v3  ;;  %v1094_v13 = vld [vmem:[%s1249_s5 + $0x58] sm:$0xff]   ;;  %v1096_v15 = vld [vmem:[%s1249_s5 + $0x60] sm:$0xff]   ;;  %v1098_v17 = vld [vmem:[%s1249_s5 + $0x68] sm:$0xff]   ;;  %p1110_p0 = scmp.lt.s32.totalorder %s1313_s23, %s1108_s29  ;;  %p1111_p1 = scmp.lt.s32.totalorder %s1109_s30, %s1103_s27 }
  0x1c   : > { %992 = vmatprep.subr.bf16.mxu0 %v1085_v6  ;;  %1032 = vmatprep.subr.bf16.mxu1 %v1085_v6  ;;  %v1099_v18 = vld [vmem:[%s1249_s5 + $0x30] sm:$0xff]   ;;  %v1101_v20 = vld [vmem:[%s1249_s5 + $0x38] sm:$0xff]   ;;  %p1106_p13 = pneg %p1105_p12 }
  0x1d   : > { %v1100_v19 = vld [vmem:[%s1249_s5 + $0x70] sm:$0xff]   ;;  %v1102_v21 = vld [vmem:[%s1249_s5 + $0x78] sm:$0xff]   ;;  %p1112_p2 = por %p1111_p1, %p1110_p0 }
  0x1f   : > { %993 = vmatpush3.bf16.msra.mxu0 %v1085_v6  ;;  %1038 = vmatpush3.bf16.msra.mxu1 %v1085_v6  ;;  %p1113_p3 = pnand %p1112_p2, %p1106_p13 }
  0x20   : > { %994 = vmatprep.subr.bf16.mxu0 %v1086_v7  ;;  %1033 = vmatprep.subr.bf16.mxu1 %v1086_v7 }
  0x23   : > { %995 = vmatpush3.bf16.msra.mxu0 %v1086_v7  ;;  %1039 = vmatpush3.bf16.msra.mxu1 %v1086_v7 }
  0x26   : > { %997 = vmatmul.mubr.msk.bf16.vlgmr.msra.gmra.mrb[0].mxu0 %vm306_vm0, %v1089_v8  ;;  %1013 = vmatmul.mubr.msk.bf16.vlgmr.msra.gmra.mrb[0].mxu1 %vm306_vm0, %v1090_v9 }
  0x27   : > { %1000 = vmatprep.mubr.msk.bf16.mxu0 %vm306_vm0, %v1091_v10  ;;  %1016 = vmatprep.mubr.msk.bf16.mxu1 %vm306_vm0, %v1092_v11 }
  0x2e   : > { %1001 = vmatmul.mubr.msk.bf16.gmra.mrb[4].mxu0 %vm306_vm0, %v1093_v12  ;;  %1017 = vmatmul.mubr.msk.bf16.gmra.mrb[4].mxu1 %vm306_vm0, %v1094_v13 }
  0x2f   : > { %1004 = vmatprep.mubr.msk.bf16.mxu0 %vm306_vm0, %v1095_v14  ;;  %1020 = vmatprep.mubr.msk.bf16.mxu1 %vm306_vm0, %v1096_v15 }
  0x36   : > { %1005 = vmatmul.mubr.msk.bf16.gmra.mrb[8].mxu0 %vm306_vm0, %v1097_v16  ;;  %1021 = vmatmul.mubr.msk.bf16.gmra.mrb[8].mxu1 %vm306_vm0, %v1098_v17 }
  0x37   : > { %1008 = vmatprep.mubr.msk.bf16.mxu0 %vm306_vm0, %v1099_v18  ;;  %1024 = vmatprep.mubr.msk.bf16.mxu1 %vm306_vm0, %v1100_v19 }
  0x3e   : > { %1009 = vmatmul.mubr.msk.bf16.gmra.mrb[12].mxu0 %vm306_vm0, %v1101_v20  ;;  %1025 = vmatmul.mubr.msk.bf16.gmra.mrb[12].mxu1 %vm306_vm0, %v1102_v21 }
  0xf9   : > { %v998_v22 = vpop.f32.mrb[0].mxu0  ;;  %v1014_v23 = vpop.f32.mrb[0].mxu1 }
  0xfa   : > { %v389_v24 = vpop.f32.mrb[1].mxu0  ;;  %v453_v25 = vpop.f32.mrb[1].mxu1 }
  0xfb   : > { %v999_v26 = vpop.f32.mrb[2].mxu0  ;;  %v1015_v27 = vpop.f32.mrb[2].mxu1 }
  0xfc   : > { %v875_v28 = vpack.c.bf16 %v999_v26, %v998_v22  ;;  %v915_v29 = vpack.c.bf16 %v1015_v27, %v1014_v23  ;;  %v392_v30 = vpop.f32.mrb[3].mxu0  ;;  %v456_v31 = vpop.f32.mrb[3].mxu1 }
  0xfd   : > { %v870_v32 = vpack.c.bf16 %v392_v30, %v389_v24  ;;  %v910_v33 = vpack.c.bf16 %v456_v31, %v453_v25 }
  0xfe   : > { %947 = vst [vmem:[%s1292_s21 + $0x8] sm:$0xff] %v875_v28   ;;  %955 = vst [vmem:[%s1292_s21 + $0x48] sm:$0xff] %v915_v29  }
  0xff   : > { %871 = vst [vmem:[%s1292_s21] sm:$0xff] %v870_v32   ;;  %954 = vst [vmem:[%s1292_s21 + $0x40] sm:$0xff] %v910_v33  }
 0x101   : > { %v1002_v34 = vpop.f32.mrb[4].mxu0  ;;  %v1018_v35 = vpop.f32.mrb[4].mxu1 }
 0x102   : > { %v405_v36 = vpop.f32.mrb[5].mxu0  ;;  %v469_v37 = vpop.f32.mrb[5].mxu1 }
 0x103   : > { %v1003_v38 = vpop.f32.mrb[6].mxu0  ;;  %v1019_v39 = vpop.f32.mrb[6].mxu1 }
 0x104   : > { %v885_v40 = vpack.c.bf16 %v1003_v38, %v1002_v34  ;;  %v925_v41 = vpack.c.bf16 %v1019_v39, %v1018_v35  ;;  %v408_v42 = vpop.f32.mrb[7].mxu0  ;;  %v472_v43 = vpop.f32.mrb[7].mxu1 }
 0x105   : > { %v880_v44 = vpack.c.bf16 %v408_v42, %v405_v36  ;;  %v920_v45 = vpack.c.bf16 %v472_v43, %v469_v37 }
 0x106   : > { %949 = vst [vmem:[%s1292_s21 + $0x18] sm:$0xff] %v885_v40   ;;  %957 = vst [vmem:[%s1292_s21 + $0x58] sm:$0xff] %v925_v41  }
 0x107   : > { %948 = vst [vmem:[%s1292_s21 + $0x10] sm:$0xff] %v880_v44   ;;  %956 = vst [vmem:[%s1292_s21 + $0x50] sm:$0xff] %v920_v45  }
 0x109   : > { %v1006_v46 = vpop.f32.mrb[8].mxu0  ;;  %v1022_v47 = vpop.f32.mrb[8].mxu1 }
 0x10a   : > { %v421_v48 = vpop.f32.mrb[9].mxu0  ;;  %v485_v49 = vpop.f32.mrb[9].mxu1 }
 0x10b   : > { %v1007_v50 = vpop.f32.mrb[10].mxu0  ;;  %v1023_v51 = vpop.f32.mrb[10].mxu1 }
 0x10c   : > { %v895_v52 = vpack.c.bf16 %v1007_v50, %v1006_v46  ;;  %v935_v53 = vpack.c.bf16 %v1023_v51, %v1022_v47  ;;  %v424_v54 = vpop.f32.mrb[11].mxu0  ;;  %v488_v55 = vpop.f32.mrb[11].mxu1 }
 0x10d   : > { %v890_v56 = vpack.c.bf16 %v424_v54, %v421_v48  ;;  %v930_v57 = vpack.c.bf16 %v488_v55, %v485_v49 }
 0x10e   : > { %951 = vst [vmem:[%s1292_s21 + $0x28] sm:$0xff] %v895_v52   ;;  %959 = vst [vmem:[%s1292_s21 + $0x68] sm:$0xff] %v935_v53  }
 0x10f   : > { %950 = vst [vmem:[%s1292_s21 + $0x20] sm:$0xff] %v890_v56   ;;  %958 = vst [vmem:[%s1292_s21 + $0x60] sm:$0xff] %v930_v57  }
 0x111   : > { %v1010_v58 = vpop.f32.mrb[12].mxu0  ;;  %v1026_v59 = vpop.f32.mrb[12].mxu1 }
 0x112   : > { %v437_v60 = vpop.f32.mrb[13].mxu0  ;;  %v501_v61 = vpop.f32.mrb[13].mxu1 }
 0x113   : > { %v1011_v62 = vpop.f32.mrb[14].mxu0  ;;  %v1027_v63 = vpop.f32.mrb[14].mxu1 }
 0x114   : > { %v905_v0 = vpack.c.bf16 %v1011_v62, %v1010_v58  ;;  %v945_v1 = vpack.c.bf16 %v1027_v63, %v1026_v59  ;;  %v440_v2 = vpop.f32.mrb[15].mxu0  ;;  %v504_v3 = vpop.f32.mrb[15].mxu1 }
 0x115   : > { %v900_v4 = vpack.c.bf16 %v440_v2, %v437_v60  ;;  %v940_v5 = vpack.c.bf16 %v504_v3, %v501_v61 }
 0x116   : > { %953 = vst [vmem:[%s1292_s21 + $0x38] sm:$0xff] %v905_v0   ;;  %961 = vst [vmem:[%s1292_s21 + $0x78] sm:$0xff] %v945_v1  }
 0x117   : > { %952 = vst [vmem:[%s1292_s21 + $0x30] sm:$0xff] %v900_v4   ;;  %960 = vst [vmem:[%s1292_s21 + $0x70] sm:$0xff] %v940_v5  }
 0x118   : > { %1116 = shalt.err (!%p1113_p3)
}
 0x119   : > { %s1117_s3 = scalar_lea.hbm %s1311_s26, 2048  ;;  %s1121_s6 = scalar_lea.hbm %s1364_s2, 4096 }
 0x11a   : > { %p1118_p4 = scmp.ne.s32.totalorder %s1311_s26, %s1117_s3  ;;  %p1122_p9 = scmp.lt.u32.totalorder %s1311_s26, %s1364_s2 }
 0x11b   : > { %p1123_p10 = scmp.lt.u32.totalorder %s1121_s6, %s1117_s3  ;;  %p1125_p12 = scmp.lt.u32.totalorder %s1117_s3, %s1311_s26 }
 0x11c   : > { %p1119_p7 = pnand %p1118_p4, %p1223_p5 }
 0x11d   : > { %p1124_p11 = por %p1123_p10, %p1122_p9 }
 0x11e   : > { %p1120_p8 = pneg %p1119_p7 }
 0x11f   : > { %p1126_p13 = por %p1125_p12, %p1124_p11 }
 0x121   : > { %p1127_p0 = pnand %p1126_p13, %p1120_p8 }
 0x123   : > { %1130 = shalt.err (!%p1127_p0)
}
 0x124   : > { %s1168_s14 = smov 64   ;;  %s1169_s16 = smov 4  }
 0x125   : > { %1040 = dma.vmem_to_hbm [thread:$0]  (%p1223_p5), %s1313_s23, 2048, %s1311_s26, %s1321_s13, %s1168_s14, %s1168_s14, %s1169_s16  }
 0x126 PF: > { %p1046_p1 = scmp.ge.s32.totalorder %s1165_s12, 2  ;;  %s705_s17 = sand.u32 1, %s1153_s9  }
 0x127   : > { %s706_s21 = scalar_lea.sflag [#allocation3], %s705_s17 }
 0x128   : > { %p1043_p2 = pnand %p1046_p1, %p1227_p6 }
 0x12a   : > { %1148 = dma.done.wait (!%p1043_p2), %s706_s21, 2048  }
 0x12b   : > { %1150 = vsyncadd (!%p1043_p2), %s706_s21, 4294965248  ;;  %p12_p3 = scmp.ge.s32.totalorder %s1210_s15, 4   ;;  %s1367_s9 = smov %s1157_s10 }
 0x12c   : > { %s1368_s10 = smov %s1161_s11  ;;  %s1369_s11 = smov %s1221_s18 }
 0x12d   : > { %s1370_s12 = smov %s1210_s15  ;;  %14 = sbr.rel (!%p12_p3) target bundleno = 3 (0x3), region = 63 }
 0x134   :  { %711 = vsyncpa [#allocation3], 1 }
 0x135   :  { %713 = vsyncpa [#allocation3 + $0x1], 1 }

</bundles_post_ra>
